<compile_context>
chip_gen: v6e
topology: v6e:2x2x1
jax: 0.10.0
libtpu: 0.0.40
codegen_flags: <defaults>
</compile_context>

<pallas_src>
import jax
import jax.numpy as jnp
from jax.experimental import pallas as pl
from jax.experimental.pallas import tpu as pltpu

N_BITS = 8
QMAX = float(2 ** N_BITS - 1)          # 255
GAMMA, ZETA = -0.1, 1.1                # hard-sigmoid stretch params (as in module)


# --------------------------------------------------------------------------
# Hardware-aware sizing helpers
# --------------------------------------------------------------------------
def _hw_vmem_bytes():
    """Physical VMEM per TensorCore, with a conservative fallback (v7x = 64 MiB)."""
    try:
        info = pltpu.get_tpu_info()
        for name in ("vmem_capacity_bytes", "vmem_size_bytes"):
            v = getattr(info, name, None)
            if v:
                return int(v)
    except Exception:
        pass
    return 64 << 20


def _tile_budget_bytes(n_streams):
    """Per-tensor tile budget: n_streams x double-buffer must fit with headroom."""
    vmem = _hw_vmem_bytes()
    budget = vmem // (n_streams * 2 * 4)     # use at most ~1/4 of physical VMEM
    return int(max(1 << 20, min(4 << 20, budget)))


def _choose_layout(n, itemsize, n_streams):
    """Pick (lanes, rows, block_rows, lane_pad) for a flat element count n."""
    if n % 512 == 0:
        lanes = 512
    elif n % 256 == 0:
        lanes = 256
    else:
        lanes = 128                      # may need a <=127-element flat pad (rare)
    lane_pad = (-n) % lanes
    rows = (n + lane_pad) // lanes

    budget = _tile_budget_bytes(n_streams)
    # Worst-case stream width is f32 (4 B/elem).  Keep block_rows a multiple of
    # 32 so ragged last blocks stay legal for f32 / bf16 / f16 sublane tiling.
    cap = max(32, (budget // (lanes * 4)) // 32 * 32)

    if rows > cap:
        block_rows = cap                              # big blocks; ragged tail OK
    elif rows * lanes * itemsize > (1 << 20) and rows >= 64:
        # >1 MiB tensor that would otherwise be a single grid step: split into
        # (at least) two steps so both v7x TensorCores get work.
        block_rows = max(32, ((rows + 1) // 2 + 31) // 32 * 32)
    else:
        block_rows = rows                             # single full-extent block
    return lanes, rows, block_rows, lane_pad


# --------------------------------------------------------------------------
# Kernels
# --------------------------------------------------------------------------
def _quant_nearest_kernel(scale_ref, x_ref, out_ref):
    """round_mode == 'nearest'.  scale_ref: SMEM f32[3] = [1/delta, delta, zp]."""
    inv_delta = scale_ref[0]
    delta = scale_ref[1]
    zp = scale_ref[2]
    xs = (x_ref[...].astype(jnp.float32) - zp) * inv_delta
    x_quant = jnp.clip(jnp.round(xs), 0.0, QMAX)
    out_ref[...] = (x_quant * delta + zp).astype(out_ref.dtype)


def _quant_adaround_kernel(scale_ref, x_ref, alpha_ref, out_ref):
    """Adaptive-rounding path (soft_targets=False): floor + (alpha >= 0)."""
    inv_delta = scale_ref[0]
    delta = scale_ref[1]
    zp = scale_ref[2]
    xs = (x_ref[...].astype(jnp.float32) - zp) * inv_delta
    x_int = jnp.floor(xs) + (alpha_ref[...] >= 0.0).astype(jnp.float32)
    out_ref[...] = (jnp.clip(x_int, 0.0, QMAX) * delta + zp).astype(out_ref.dtype)


# --------------------------------------------------------------------------
# Wrapper
# --------------------------------------------------------------------------
def adaptive_rounding_quantize(x, alpha=None, delta=None, zero_point=None, *,
                               round_mode="nearest"):
    """Pallas wrapper reproducing AdaptiveRoundingQuantizer.forward.

    Supports round_mode='nearest' and the adaptive-rounding path with
    soft_targets=False (hard rounding via sign of alpha).
    """
    # TODO(synk): soft_targets=True / get_rest() sigmoid relaxations are a
    # training-time relaxation; only the inference forward paths are lowered.
    orig_shape = x.shape
    nearest = (round_mode == "nearest")

    # Stream in native floating dtype (no wrapper-side astype => no extra HBM pass).
    if not jnp.issubdtype(x.dtype, jnp.floating):
        x = x.astype(jnp.float32)
    out_dtype = x.dtype
    x_flat = x.reshape(-1)
    n = x_flat.shape[0]

    n_streams = 2 if nearest else 3
    lanes, rows, block_rows, lane_pad = _choose_layout(
        n, jnp.dtype(out_dtype).itemsize, n_streams)
    num_blocks = int(pl.cdiv(rows, block_rows))

    def to2d(a_flat):
        if lane_pad:
            # Rare fallback (flat size not a multiple of 128); costs one extra
            # HBM pass over the tensor but is never hit for BERT-style shapes.
            a_flat = jnp.pad(a_flat, (0, lane_pad))
        return a_flat.reshape(rows, lanes)

    # index_maps receive the scalar-prefetch ref as a trailing positional arg.
    def tile_spec():
        return pl.BlockSpec((block_rows, lanes), lambda i, scale: (i, 0))

    operands = [to2d(x_flat)]
    in_specs = [tile_spec()]
    if nearest:
        kern = _quant_nearest_kernel
    else:
        kern = _quant_adaround_kernel
        a_flat = alpha.reshape(-1)
        if not jnp.issubdtype(a_flat.dtype, jnp.floating):
            a_flat = a_flat.astype(jnp.float32)
        operands.append(to2d(a_flat))      # only the sign is used; keep native dtype
        in_specs.append(tile_spec())

    delta_f = jnp.asarray(delta, jnp.float32).reshape(())
    zp_f = jnp.asarray(zero_point, jnp.float32).reshape(())
    # Exact reciprocal computed once in the wrapper so the per-element divide
    # becomes a multiply (NOT an approximate in-kernel reciprocal).
    scale = jnp.stack([1.0 / delta_f, delta_f, zp_f])

    vmem_cap = _hw_vmem_bytes()
    out = pl.pallas_call(
        kern,
        out_shape=jax.ShapeDtypeStruct((rows, lanes), out_dtype),
        grid_spec=pltpu.PrefetchScalarGridSpec(
            num_scalar_prefetch=1,          # scale -> SMEM once, before the grid
            grid=(num_blocks,),
            in_specs=in_specs,
            out_specs=tile_spec(),
        ),
        compiler_params=pltpu.CompilerParams(
            dimension_semantics=("parallel",),
            vmem_limit_bytes=int(min(vmem_cap // 2, 64 << 20)),
        ),
    )(scale, *operands)

    out_flat = out.reshape(-1)
    if lane_pad:
        out_flat = out_flat[:n]
    return out_flat.reshape(orig_shape)


# --------------------------------------------------------------------------
# Self-test
# --------------------------------------------------------------------------
if __name__ == "__main__":
    key = jax.random.PRNGKey(0)

    def make_params(x):
        # mirrors __init__ / set_quant_params (computed in f32)
        xf = x.astype(jnp.float32)
        x_min = jnp.min(xf)
        x_max = jnp.max(xf)
        delta = jnp.maximum((x_max - x_min) / QMAX, 1e-8)
        zero_point = x_min
        xs = (xf - zero_point) / delta
        rest = xs - jnp.floor(xs)
        alpha = -jnp.log((ZETA - GAMMA) / (rest - GAMMA) - 1.0)
        return delta, zero_point, alpha

    def reference(x, alpha, delta, zero_point, nearest):
        # Same math as the kernel (exact 1/delta multiply).  Matches the
        # PyTorch divide everywhere except values within ~1 ulp of a rounding
        # boundary, where either rounding is acceptable for quantization.
        xf = x.astype(jnp.float32)
        xs = (xf - zero_point) * (1.0 / delta)
        if nearest:
            x_int = jnp.round(xs)
        else:
            x_int = jnp.floor(xs) + (alpha.astype(jnp.float32) >= 0.0).astype(jnp.float32)
        return jnp.clip(x_int, 0.0, QMAX) * delta + zero_point

    def check(x, tol):
        d, z, a = make_params(x)
        o_n = adaptive_rounding_quantize(x, None, d, z, round_mode="nearest")
        o_a = adaptive_rounding_quantize(x, a, d, z,
                                         round_mode="learned_hard_sigmoid")
        jax.block_until_ready((o_n, o_a))
        assert o_n.shape == x.shape and o_a.shape == x.shape
        assert o_n.dtype == x.dtype and o_a.dtype == x.dtype
        rn = reference(x, a, d, z, True)
        ra = reference(x, a, d, z, False)
        assert jnp.allclose(o_n.astype(jnp.float32), rn, atol=tol, rtol=0), "nearest"
        assert jnp.allclose(o_a.astype(jnp.float32), ra, atol=tol, rtol=0), "adaround"
        return d

    k1, k2, k3, k4 = jax.random.split(key, 4)

    # 1) small NCHW activation (single full-extent block), f32
    x1 = jax.random.normal(k1, (2, 4, 16, 16), dtype=jnp.float32)
    check(x1, 1e-5)

    # 2) BERT-ish slab: multi-block grid, even split for the two v7x TCs, f32
    x2 = jax.random.normal(k2, (8, 128, 768), dtype=jnp.float32)
    check(x2, 1e-5)

    # 3) >1 MiB slab whose row count is not a block multiple: ragged last block, f32
    x3 = jax.random.normal(k3, (2, 300, 512), dtype=jnp.float32)
    check(x3, 1e-5)

    # 4) bf16 activations (native-dtype streaming, mixed-dtype alpha stream,
    #    ragged last block); tolerance = one quant step + bf16 output rounding.
    x4 = jax.random.normal(k4, (2, 300, 512), dtype=jnp.float32).astype(jnp.bfloat16)
    d4 = check(x4, float(make_params(x4)[0]) + 0.05)

    print("KERNEL_OK")
</pallas_src>

<mosaic_0001>
module attributes {stable_mosaic.version = 11 : i64} {
  func.func @_quant_nearest_kernel(%arg0: i32, %arg1: memref<3xf32, #tpu.memory_space<smem>>, %arg2: memref<4x512xf32, #tpu.memory_space<vmem>>, %arg3: memref<4x512xf32, #tpu.memory_space<vmem>>) attributes {dimension_semantics = [#tpu.dimension_semantics<parallel>], iteration_bounds = array<i64: 1>, scalar_prefetch = 1 : i64, scratch_operands = 0 : i64, tpu.core_type = #tpu.core_type<tc>, window_params = [{transform_indices = @transform_0, window_bounds = array<i64: 4, 512>}, {transform_indices = @transform_1, window_bounds = array<i64: 4, 512>}]} {
    %c0 = arith.constant 0 : index
    %0 = memref.load %arg1[%c0] : memref<3xf32, #tpu.memory_space<smem>>
    %c1 = arith.constant 1 : index
    %1 = memref.load %arg1[%c1] : memref<3xf32, #tpu.memory_space<smem>>
    %c2 = arith.constant 2 : index
    %2 = memref.load %arg1[%c2] : memref<3xf32, #tpu.memory_space<smem>>
    %c0_0 = arith.constant 0 : index
    %c0_1 = arith.constant 0 : index
    %3 = vector.load %arg2[%c0_0, %c0_1] : memref<4x512xf32, #tpu.memory_space<vmem>>, vector<4x512xf32>
    %4 = vector.broadcast %2 : f32 to vector<4x512xf32>
    %5 = arith.subf %3, %4 : vector<4x512xf32>
    %6 = vector.broadcast %0 : f32 to vector<4x512xf32>
    %7 = arith.mulf %5, %6 : vector<4x512xf32>
    %8 = math.roundeven %7 : vector<4x512xf32>
    %cst = arith.constant 0.000000e+00 : f32
    %cst_2 = arith.constant 2.550000e+02 : f32
    %9 = vector.broadcast %cst : f32 to vector<4x512xf32>
    %10 = arith.maximumf %9, %8 : vector<4x512xf32>
    %11 = vector.broadcast %cst_2 : f32 to vector<4x512xf32>
    %12 = arith.minimumf %11, %10 : vector<4x512xf32>
    %13 = vector.broadcast %1 : f32 to vector<4x512xf32>
    %14 = arith.mulf %12, %13 : vector<4x512xf32>
    %15 = vector.broadcast %2 : f32 to vector<4x512xf32>
    %16 = arith.addf %14, %15 : vector<4x512xf32>
    %c0_3 = arith.constant 0 : index
    %c0_4 = arith.constant 0 : index
    %17 = vector.load %arg3[%c0_3, %c0_4] : memref<4x512xf32, #tpu.memory_space<vmem>>, vector<4x512xf32>
    tpu.vector_store %arg3[%c0_3, %c0_4], %16 {strides = array<i32>} : memref<4x512xf32, #tpu.memory_space<vmem>>, vector<4x512xf32>,
    return
  }
  func.func @transform_0(%arg0: i32, %arg1: memref<3xf32, #tpu.memory_space<smem>>) -> (i32, i32) {
    %c0_i32 = arith.constant 0 : i32
    %c0_i32_0 = arith.constant 0 : i32
    return %arg0, %c0_i32 : i32, i32
  }
  func.func @transform_1(%arg0: i32, %arg1: memref<3xf32, #tpu.memory_space<smem>>) -> (i32, i32) {
    %c0_i32 = arith.constant 0 : i32
    %c0_i32_0 = arith.constant 0 : i32
    return %arg0, %c0_i32 : i32, i32
  }
}

</mosaic_0001>

<bundles_post_ra>
// kernel: tpu_custom_call.1
= control target key start
LH: loop header
LB: loop body
LE: loop exit
PB: predicated region body
PF: predicated region fallthrough
CT: control target
= control target key end

     0   :  { %s140_s9 = smov [#allocation3]   ;;  %s167_s0 = inlined_call_operand.hbm [shape: f32[3], index: 0, kind: input, shape index: {}]   ;;  %s168_s1 = inlined_call_operand.hbm [shape: f32[4,512], index: 1, kind: input, shape index: {}]   ;;  %s169_s2 = inlined_call_operand.hbm [shape: f32[4,512], index: 2, kind: output, shape index: {}]  }
   0x1   :  { %8 = dma.hbm_to_smem %s167_s0, 16, %s140_s9, [#allocation2] }
   0x2   :  { %134 = dma.done.wait [#allocation2], 16 }
   0x3   :  { %135 = vsyncadd [#allocation2], 4294967280 }
   0x4   :  { %10 = sfence }
   0x5   :  { %11 = vsyncpa [#allocation5], 0 }
   0x6   :  { %12 = vsyncpa [#allocation6], 0  ;;  %s141_s12 = smov [#allocation4]  }
   0x7   :  { %s19_s13 = sshll.u32 %s141_s12, 4  ;;  %s20_s13 = int_to_ptr.vmem [resolvable:$true] %s19_s13 }
   0x8   :  { %s102_s14 = scalar_lea.vmem %s20_s13, 256  ;;  %p107_p1 = scmp.lt.s32.totalorder %s20_s13, %s20_s13 }
   0x9   :  { %p103_p0 = scmp.ne.s32.totalorder %s20_s13, %s102_s14  ;;  %p108_p2 = scmp.lt.s32.totalorder %s102_s14, %s102_s14 }
   0xb   :  { %p109_p3 = por %p108_p2, %p107_p1 }
   0xd   :  { %p110_p4 = pnand %p109_p3, %p103_p0 }
   0xf   :  { %113 = shalt.err (!%p110_p4)
}
  0x10   :  { %22 = dma.hbm_to_vmem [thread:$0]  %s168_s1, 256, %s20_s13, [#allocation5]  }
  0x11   :  { %136 = dma.done.wait [#allocation5], 256  }
  0x12   :  { %137 = vsyncadd [#allocation5], 4294967040  ;;  %s26_s0 = sld [smem:[#allocation3]]  ;;  %v29_v0 = vld [vmem:[#allocation4] sm:$0xff]  ;;  %v30_v1 = vld [vmem:[#allocation4 + $0x8] sm:$0xff]  ;;  %s142_s1 = smov [#allocation7]  }
  0x13   :  { %s66_s17 = sld [smem:[#allocation3 + $0x2]]  ;;  %s56_s19 = sshll.u32 %s142_s1, 4  ;;  %s57_s19 = int_to_ptr.vmem [resolvable:$true] %s56_s19 }
  0x14   :  { %s65_s18 = sld [smem:[#allocation3 + $0x1]]  ;;  %s114_s20 = scalar_lea.vmem %s57_s19, 256 }
  0x15   :  { %p115_p5 = scmp.ne.s32.totalorder %s57_s19, %s114_s20  ;;  %p119_p6 = scmp.lt.s32.totalorder %s57_s19, %s57_s19 }
  0x16   :  { %p120_p7 = scmp.lt.s32.totalorder %s114_s20, %s114_s20 }
  0x18   :  { %v34_v3 = vstv %s26_s0  ;;  %p121_p8 = por %p120_p7, %p119_p6 }
  0x19   :  { %v31_v2 = vstv %s66_s17 }
  0x1a   :  { %v32_v4 = vsub.f32 %v29_v0, %v31_v2  ;;  %v33_v5 = vsub.f32 %v30_v1, %v31_v2  ;;  %v43_v23 = vstv %s65_s18  ;;  %p122_p9 = pnand %p121_p8, %p115_p5 }
  0x1c   :  { %v35_v6 = vmul.f32 %v34_v3, %v32_v4  ;;  %v36_v7 = vmul.f32 %v34_v3, %v33_v5 }
  0x1e   :  { %v69_v8 = vcvt.f32.s32 %v35_v6  ;;  %v67_v9 = vand.u32 2147483647, %v35_v6  ;;  %v77_v10 = vcvt.f32.s32 %v36_v7  ;;  %v72_v12 = vand.u32 2147483648, %v35_v6 }
  0x1f   :  { %v75_v13 = vand.u32 2147483647, %v36_v7  ;;  %v80_v15 = vand.u32 2147483648, %v36_v7 }
  0x20   :  { %v70_v11 = vcvt.s32.f32 %v69_v8  ;;  %v78_v14 = vcvt.s32.f32 %v77_v10  ;;  %vm68_vm0 = vcmp.lt.f32.partialorder %v67_v9, 8388608.0 }
  0x21   :  { %vm76_vm1 = vcmp.lt.f32.partialorder %v75_v13, 8388608.0 }
  0x22   :  { %v71_v16 = vand.u32 2147483647, %v70_v11  ;;  %v79_v17 = vand.u32 2147483647, %v78_v14 }
  0x24   :  { %v73_v18 = vor.u32 %v72_v12, %v71_v16  ;;  %v81_v19 = vor.u32 %v80_v15, %v79_v17 }
  0x26   :  { %v74_v20 = vsel %vm68_vm0, %v73_v18, %v35_v6  ;;  %v82_v22 = vsel %vm76_vm1, %v81_v19, %v36_v7 }
  0x27   :  { %v39_v21 = vmax.f32 %v74_v20, 0.0  ;;  %v40_v24 = vmax.f32 %v82_v22, 0.0 }
  0x29   :  { %v41_v25 = vmin.f32 %v39_v21, 255.0  ;;  %v42_v26 = vmin.f32 %v40_v24, 255.0 }
  0x2b   :  { %v44_v27 = vmul.f32 %v43_v23, %v41_v25  ;;  %v45_v28 = vmul.f32 %v43_v23, %v42_v26 }
  0x2d   :  { %v46_v29 = vadd.f32 %v44_v27, %v31_v2  ;;  %v47_v30 = vadd.f32 %v45_v28, %v31_v2 }
  0x2f   :  { %48 = vst [vmem:[#allocation7] sm:$0xff] %v46_v29  ;;  %49 = vst [vmem:[#allocation7 + $0x8] sm:$0xff] %v47_v30 }
  0x30   :  { %125 = shalt.err (!%p122_p9)
}
  0x31   :  { %59 = dma.vmem_to_hbm [thread:$0]  %s57_s19, 256, %s169_s2, [#allocation6]  }
  0x32   :  { %138 = dma.done.wait [#allocation6], 256  }
  0x33   :  { %139 = vsyncadd [#allocation6], 4294967040 }
  0x34   :  { %63 = vsyncpa [#allocation5], 1 }
  0x35   :  { %64 = vsyncpa [#allocation6], 1 }

</bundles_post_ra>
